<compile_context>
chip_gen: v6e
topology: v6e:2x2x1
jax: 0.10.0
libtpu: 0.0.40
codegen_flags: <defaults>
</compile_context>

<pallas_src>
from typing import NamedTuple

import jax
import jax.numpy as jnp
from jax.experimental import pallas as pl
from jax.experimental.pallas import tpu as pltpu


def _round_up(x, m):
    return ((x + m - 1) // m) * m


def _pick_tile(dim, target, align):
    """Largest multiple of `align` that divides round_up(dim, align) and is
    <= target, so padding waste per tiled axis stays below `align`."""
    padded = _round_up(max(dim, 1), align)
    target = max(align, min(target, padded))
    best = align
    t = align
    while t <= target:
        if padded % t == 0:
            best = t
        t += align
    return best


# ---------------------------------------------------------------------------
# Kernels
# ---------------------------------------------------------------------------

def _ia3_linear_kernel(x_ref, lam_ref, w_ref, b_ref, o_ref, acc_ref):
    """General (i, j, k) grid step with a K-resident f32 accumulator.

    x_ref:   (tm, tk)    activation tile (compute dtype)
    lam_ref: (1, K_pad)  full IA3 scale row, f32, VMEM-resident (index map 0,0)
    w_ref:   (tk, tn)    pre-transposed weight tile (In, Out), compute dtype
    b_ref:   (1, tn)     bias row, f32 (applied only at finalize)
    o_ref:   (tm, tn)    output tile
    acc_ref: (tm, tn)    f32 accumulator scratch
    """
    k = pl.program_id(2)
    tk = x_ref.shape[1]

    @pl.when(k == 0)
    def _():
        acc_ref[...] = jnp.zeros_like(acc_ref)

    start = pl.multiple_of(k * tk, 128)
    lam = lam_ref[:, pl.ds(start, tk)]                    # (1, tk) f32
    # IA3 scale in f32 on the VPU; single rounding into the MXU dtype.
    x_scaled = (x_ref[...] * lam).astype(w_ref.dtype)
    acc_ref[...] += jnp.dot(x_scaled, w_ref[...],
                            preferred_element_type=jnp.float32)

    @pl.when(k == pl.num_programs(2) - 1)
    def _():
        o_ref[...] = (acc_ref[...] + b_ref[...]).astype(o_ref.dtype)


def _ia3_linear_kernel_single_k(x_ref, lam_ref, w_ref, b_ref, o_ref):
    """K fits in one tile: no accumulator scratch / extra copy."""
    x_scaled = (x_ref[...] * lam_ref[...]).astype(w_ref.dtype)
    acc = jnp.dot(x_scaled, w_ref[...], preferred_element_type=jnp.float32)
    o_ref[...] = (acc + b_ref[...]).astype(o_ref.dtype)


# ---------------------------------------------------------------------------
# One-time weight preparation (cache this for static W)
# ---------------------------------------------------------------------------

class IA3LinearParams(NamedTuple):
    wt: jax.Array          # (K_pad, N_pad) pre-transposed, padded, compute dtype
    bias: jax.Array        # (1, N_pad) f32
    in_features: int
    out_features: int
    tk: int
    tn: int


def prepare_ia3_linear(w, b, *, compute_dtype=jnp.bfloat16,
                       tn_target=512, tk_target=1024):
    """Transpose/pad/cast the Linear weight once.  w: (Out, In), b: (Out,)."""
    out_features, in_features = w.shape
    tk = _pick_tile(in_features, tk_target, 128)
    tn = _pick_tile(out_features, tn_target, 128)
    k_pad = _round_up(in_features, tk)
    n_pad = _round_up(out_features, tn)

    wt = jnp.transpose(w).astype(compute_dtype)           # (In, Out), lane-dense
    wt = jnp.pad(wt, ((0, k_pad - in_features), (0, n_pad - out_features)))
    bias = jnp.pad(b.astype(jnp.float32).reshape(1, out_features),
                   ((0, 0), (0, n_pad - out_features)))
    return IA3LinearParams(wt, bias, in_features, out_features, tk, tn)


# ---------------------------------------------------------------------------
# Forward
# ---------------------------------------------------------------------------

def ia3_linear_forward(x, lam, params, *, tm_target=256, out_dtype=None,
                       weight_buffers=3):
    """y = (x * lam) @ W.T + b using prepared weights.  x: (B, In)."""
    batch, in_features = x.shape
    assert in_features == params.in_features
    k_pad, n_pad = params.wt.shape
    tk, tn = params.tk, params.tn
    compute_dtype = params.wt.dtype
    out_dtype = x.dtype if out_dtype is None else out_dtype

    tm = _pick_tile(batch, tm_target, 8)
    m_pad = _round_up(batch, tm)

    # Zero padding is exact: padded K columns contribute 0 to the dot product;
    # padded M rows / N columns are sliced off below.
    xp = jnp.pad(x.astype(compute_dtype),
                 ((0, m_pad - batch), (0, k_pad - in_features)))
    lamp = jnp.pad(lam.astype(jnp.float32).reshape(1, in_features),
                   ((0, 0), (0, k_pad - in_features)))

    m_grid, n_grid, k_grid = m_pad // tm, n_pad // tn, k_pad // tk
    grid = (m_grid, n_grid, k_grid)
    # Note (v7x megacore): sharding needs m_grid * n_grid >= 2; for decode
    # shapes pick tn so Out spans several tiles, otherwise one TC is idle.

    # Deeper buffering on the weight stream in the small-batch regime.
    w_map = lambda i, j, k: (k, j)
    if (weight_buffers and weight_buffers != 2 and m_grid == 1
            and n_grid * k_grid >= weight_buffers):
        w_spec = pl.BlockSpec((tk, tn), w_map,
                              pipeline_mode=pl.Buffered(weight_buffers))
        n_w_bufs = weight_buffers
    else:
        w_spec = pl.BlockSpec((tk, tn), w_map)
        n_w_bufs = 2

    in_specs = [
        pl.BlockSpec((tm, tk), lambda i, j, k: (i, k)),    # x
        pl.BlockSpec((1, k_pad), lambda i, j, k: (0, 0)),  # lambda (resident)
        w_spec,                                            # W^T (In, Out)
        pl.BlockSpec((1, tn), lambda i, j, k: (0, j)),     # bias
    ]
    out_spec = pl.BlockSpec((tm, tn), lambda i, j, k: (i, j))

    if k_grid == 1:
        kernel = _ia3_linear_kernel_single_k
        scratch_shapes = []
    else:
        kernel = _ia3_linear_kernel
        scratch_shapes = [pltpu.VMEM((tm, tn), jnp.float32)]

    # VMEM budget (pipeline buffers + scratch), with headroom; floored at the
    # 32 MiB scoped default, kept below v7x's 64 MiB physical per-core VMEM.
    csize = jnp.dtype(compute_dtype).itemsize
    osize = jnp.dtype(out_dtype).itemsize
    vmem_est = (2 * tm * tk * csize + n_w_bufs * tk * tn * csize
                + 2 * k_pad * 4 + 2 * tn * 4
                + 2 * tm * tn * osize + tm * tn * 4)
    vmem_limit = int(min(max(vmem_est * 3 // 2, 32 << 20), 56 << 20))

    out_padded = pl.pallas_call(
        kernel,
        out_shape=jax.ShapeDtypeStruct((m_pad, n_pad), out_dtype),
        grid_spec=pltpu.PrefetchScalarGridSpec(
            num_scalar_prefetch=0,
            grid=grid,
            in_specs=in_specs,
            out_specs=out_spec,
            scratch_shapes=scratch_shapes,
        ),
        compiler_params=pltpu.CompilerParams(
            dimension_semantics=("parallel", "parallel", "arbitrary"),
            vmem_limit_bytes=vmem_limit,
        ),
    )(xp, lamp, params.wt, params.bias)

    return out_padded[:batch, :params.out_features]


def ia3_wrapper_forward(x, lam, w, b, *, compute_dtype=jnp.bfloat16,
                        tm_target=256, tn_target=512, tk_target=1024,
                        out_dtype=None, weight_buffers=3):
    """One-shot convenience (re-preps W every call).  Prefer
    prepare_ia3_linear(...) once + ia3_linear_forward(...) when W is static."""
    params = prepare_ia3_linear(w, b, compute_dtype=compute_dtype,
                                tn_target=tn_target, tk_target=tk_target)
    return ia3_linear_forward(x, lam, params, tm_target=tm_target,
                              out_dtype=out_dtype,
                              weight_buffers=weight_buffers)


if __name__ == "__main__":
    # Small shapes consistent with IA3Wrapper(nn.Linear(in, out)).
    batch = 16
    in_features = 256
    out_features = 192   # not a multiple of 128 -> exercises padding + slice

    key = jax.random.PRNGKey(0)
    kx, kl, kw, kb = jax.random.split(key, 4)
    x = jax.random.normal(kx, (batch, in_features), dtype=jnp.float32)
    # PyTorch inits lambda to ones; perturb it so the check is non-trivial.
    lam = 1.0 + 0.1 * jax.random.normal(kl, (in_features,), dtype=jnp.float32)
    w = 0.1 * jax.random.normal(kw, (out_features, in_features), dtype=jnp.float32)
    b = 0.1 * jax.random.normal(kb, (out_features,), dtype=jnp.float32)

    ref = (x * lam[None, :]) @ w.T + b[None, :]

    # (A) Production path: one-time weight prep (bf16 MXU), default tiles.
    #     These small shapes collapse to a (1, 1, 1) grid / single-K fast path.
    params = prepare_ia3_linear(w, b)                  # compute_dtype=bf16
    out_a = jax.block_until_ready(ia3_linear_forward(x, lam, params))
    assert out_a.shape == (batch, out_features)
    assert bool(jnp.allclose(out_a, ref, atol=1e-1, rtol=1e-1))

    # (B) f32 path with small tiles -> multi-tile (2, 2, 2) grid exercising the
    #     K-resident accumulator; tight-tolerance check against the reference.
    out_b = jax.block_until_ready(
        ia3_wrapper_forward(x, lam, w, b, compute_dtype=jnp.float32,
                            tm_target=8, tn_target=128, tk_target=128))
    assert out_b.shape == (batch, out_features)
    assert bool(jnp.allclose(out_b, ref, atol=1e-4, rtol=1e-4))

    # (C) bf16 decode-style regime: single M tile, multi-tile weight stream
    #     with pl.Buffered(3) on W, multi-K accumulator.
    out_c = jax.block_until_ready(
        ia3_wrapper_forward(x, lam, w, b, tm_target=256,
                            tn_target=128, tk_target=128))
    assert out_c.shape == (batch, out_features)
    assert bool(jnp.allclose(out_c, ref, atol=1e-1, rtol=1e-1))

    print("KERNEL_OK")
</pallas_src>

<mosaic_0001>
module attributes {stable_mosaic.version = 11 : i64} {
  func.func @_ia3_linear_kernel_single_k(%arg0: i32, %arg1: i32, %arg2: i32, %arg3: memref<16x256xbf16, #tpu.memory_space<vmem>>, %arg4: memref<1x256xf32, #tpu.memory_space<vmem>>, %arg5: memref<256x256xbf16, #tpu.memory_space<vmem>>, %arg6: memref<1x256xf32, #tpu.memory_space<vmem>>, %arg7: memref<16x256xf32, #tpu.memory_space<vmem>>) attributes {dimension_semantics = [#tpu.dimension_semantics<parallel>, #tpu.dimension_semantics<parallel>, #tpu.dimension_semantics<arbitrary>], iteration_bounds = array<i64: 1, 1, 1>, scalar_prefetch = 0 : i64, scratch_operands = 0 : i64, tpu.core_type = #tpu.core_type<tc>, window_params = [{transform_indices = @transform_0, window_bounds = array<i64: 16, 256>}, {pipeline_mode = #tpu.pipeline_mode<synchronous>, transform_indices = @transform_1, window_bounds = array<i64: 1, 256>}, {transform_indices = @transform_2, window_bounds = array<i64: 256, 256>}, {transform_indices = @transform_3, window_bounds = array<i64: 1, 256>}, {transform_indices = @transform_4, window_bounds = array<i64: 16, 256>}]} {
    %c0 = arith.constant 0 : index
    %c0_0 = arith.constant 0 : index
    %0 = vector.load %arg3[%c0, %c0_0] : memref<16x256xbf16, #tpu.memory_space<vmem>>, vector<16x256xbf16>
    %c0_1 = arith.constant 0 : index
    %c0_2 = arith.constant 0 : index
    %1 = vector.load %arg4[%c0_1, %c0_2] : memref<1x256xf32, #tpu.memory_space<vmem>>, vector<1x256xf32>
    %2 = arith.extf %0 : vector<16x256xbf16> to vector<16x256xf32>
    %3 = vector.broadcast %1 : vector<1x256xf32> to vector<16x256xf32>
    %4 = arith.mulf %2, %3 : vector<16x256xf32>
    %5 = arith.truncf %4 : vector<16x256xf32> to vector<16x256xbf16>
    %c0_3 = arith.constant 0 : index
    %c0_4 = arith.constant 0 : index
    %6 = vector.load %arg5[%c0_3, %c0_4] : memref<256x256xbf16, #tpu.memory_space<vmem>>, vector<256x256xbf16>
    %cst = arith.constant dense<0.000000e+00> : vector<16x256xf32>
    %7 = tpu.matmul %5, %6, %cst {dimension_numbers = #tpu.dot_dimension_numbers<[1], [0], [0], [1], [0, 0, 1, 1], [], []>} : vector<16x256xbf16>, vector<256x256xbf16>, vector<16x256xf32> -> vector<16x256xf32>
    %c0_5 = arith.constant 0 : index
    %c0_6 = arith.constant 0 : index
    %8 = vector.load %arg6[%c0_5, %c0_6] : memref<1x256xf32, #tpu.memory_space<vmem>>, vector<1x256xf32>
    %9 = vector.broadcast %8 : vector<1x256xf32> to vector<16x256xf32>
    %10 = arith.addf %7, %9 : vector<16x256xf32>
    %c0_7 = arith.constant 0 : index
    %c0_8 = arith.constant 0 : index
    %11 = vector.load %arg7[%c0_7, %c0_8] : memref<16x256xf32, #tpu.memory_space<vmem>>, vector<16x256xf32>
    tpu.vector_store %arg7[%c0_7, %c0_8], %10 {strides = array<i32>} : memref<16x256xf32, #tpu.memory_space<vmem>>, vector<16x256xf32>,
    return
  }
  func.func @transform_0(%arg0: i32, %arg1: i32, %arg2: i32) -> (i32, i32) {
    %c0_i32 = arith.constant 0 : i32
    return %arg0, %arg2 : i32, i32
  }
  func.func @transform_1(%arg0: i32, %arg1: i32, %arg2: i32) -> (i32, i32) {
    %c0_i32 = arith.constant 0 : i32
    %c0_i32_0 = arith.constant 0 : i32
    %c0_i32_1 = arith.constant 0 : i32
    return %c0_i32, %c0_i32_0 : i32, i32
  }
  func.func @transform_2(%arg0: i32, %arg1: i32, %arg2: i32) -> (i32, i32) {
    %c0_i32 = arith.constant 0 : i32
    return %arg2, %arg1 : i32, i32
  }
  func.func @transform_3(%arg0: i32, %arg1: i32, %arg2: i32) -> (i32, i32) {
    %c0_i32 = arith.constant 0 : i32
    %c0_i32_0 = arith.constant 0 : i32
    return %c0_i32, %arg1 : i32, i32
  }
  func.func @transform_4(%arg0: i32, %arg1: i32, %arg2: i32) -> (i32, i32) {
    %c0_i32 = arith.constant 0 : i32
    return %arg0, %arg1 : i32, i32
  }
}

</mosaic_0001>

<bundles_post_ra>
// kernel: tpu_custom_call.1
= control target key start
LH: loop header
LB: loop body
LE: loop exit
PB: predicated region body
PF: predicated region fallthrough
CT: control target
= control target key end

     0   :  { %9 = vsyncpa [#allocation3], 0  ;;  %s580_s0 = inlined_call_operand.hbm [shape: bf16[16,256], index: 0, kind: input, shape index: {}]   ;;  %s581_s1 = inlined_call_operand.hbm [shape: f32[1,256], index: 1, kind: input, shape index: {}]   ;;  %s582_s2 = inlined_call_operand.hbm [shape: bf16[256,256], index: 2, kind: input, shape index: {}]   ;;  %s583_s3 = inlined_call_operand.vmem [shape: f32[1,256], index: 3, kind: input, shape index: {}]   ;;  %s584_s4 = inlined_call_operand.hbm [shape: f32[16,256], index: 4, kind: output, shape index: {}]  }
   0x1   :  { %10 = vsyncpa [#allocation6], 0 }
   0x2   :  { %11 = vsyncpa [#allocation4], 0  ;;  %s524_s15 = smov [#allocation5]   ;;  %s525_s17 = smov [#allocation2]  }
   0x3   :  { %s30_s16 = sshll.u32 %s524_s15, 4  ;;  %s17_s18 = sshll.u32 %s525_s17, 4  ;;  %s31_s16 = int_to_ptr.vmem [resolvable:$true] %s30_s16  ;;  %s18_s18 = int_to_ptr.vmem [resolvable:$true] %s17_s18 }
   0x4   :  { %s446_s19 = scalar_lea.vmem %s31_s16, 32  ;;  %p451_p1 = scmp.lt.s32.totalorder %s31_s16, %s31_s16 }
   0x5   :  { %p447_p0 = scmp.ne.s32.totalorder %s31_s16, %s446_s19  ;;  %p452_p2 = scmp.lt.s32.totalorder %s446_s19, %s446_s19 }
   0x7   :  { %p453_p3 = por %p452_p2, %p451_p1 }
   0x9   :  { %p454_p4 = pnand %p453_p3, %p447_p0 }
   0xb   :  { %457 = shalt.err (!%p454_p4)
}
   0xc   :  { %33 = dma.hbm_to_vmem [thread:$0]  %s581_s1, 32, %s31_s16, [#allocation6]  }
   0xd   :  { %s466_s22 = scalar_lea.vmem %s18_s18, 256  ;;  %p471_p6 = scmp.lt.s32.totalorder %s18_s18, %s18_s18 }
   0xe   :  { %p467_p5 = scmp.ne.s32.totalorder %s18_s18, %s466_s22  ;;  %p472_p7 = scmp.lt.s32.totalorder %s466_s22, %s466_s22 }
  0x10   :  { %p473_p8 = por %p472_p7, %p471_p6 }
  0x12   :  { %p474_p9 = pnand %p473_p8, %p467_p5 }
  0x14   :  { %477 = shalt.err (!%p474_p9)
}
  0x15   :  { %s526_s23 = smov 128   ;;  %s527_s24 = smov 8  }
  0x16   :  { %23 = dma.hbm_to_vmem [thread:$0]  %s580_s0, 256, %s18_s18, [#allocation3], %s526_s23, %s526_s23, %s527_s24  }
  0x17   :  { %s528_s27 = smov [#allocation7]  }
  0x18   :  { %s39_s28 = sshll.u32 %s528_s27, 4  ;;  %s40_s28 = int_to_ptr.vmem [resolvable:$true] %s39_s28 }
  0x19   :  { %s486_s29 = scalar_lea.vmem %s40_s28, 4096  ;;  %p491_p11 = scmp.lt.s32.totalorder %s40_s28, %s40_s28 }
  0x1a   :  { %p487_p10 = scmp.ne.s32.totalorder %s40_s28, %s486_s29  ;;  %p492_p12 = scmp.lt.s32.totalorder %s486_s29, %s486_s29 }
  0x1c   :  { %p493_p13 = por %p492_p12, %p491_p11 }
  0x1e   :  { %p494_p0 = pnand %p493_p13, %p487_p10 }
  0x20   :  { %497 = shalt.err (!%p494_p0)
}
  0x21   :  { %45 = dma.hbm_to_vmem [thread:$0]  %s582_s2, 4096, %s40_s28, [#allocation6], %s526_s23, %s526_s23, %s527_s24  }
  0x22   :  { %518 = dma.done.wait [#allocation3], 256  }
  0x23   :  { %519 = vsyncadd [#allocation3], 4294967040 }
  0x24   :  { %520 = dma.done.wait [#allocation6], 4128  }
  0x25   :  { %521 = vsyncadd [#allocation6], 4294963168  ;;  %v390_v0 = vld [vmem:[#allocation7 + $0x74] ss:$8 sps:$4 sm:$0xff]   ;;  %v392_v1 = vld [vmem:[#allocation7 + $0x70] ss:$8 sps:$4 sm:$0xff]   ;;  %v65_v8 = vlaneseq }
  0x26   :  { %285 = vmatprep.subr.bf16.mxu0 %v390_v0  ;;  %v393_v2 = vld [vmem:[#allocation7 + $0x64] ss:$8 sps:$4 sm:$0xff]   ;;  %v395_v3 = vld [vmem:[#allocation7 + $0x60] ss:$8 sps:$4 sm:$0xff]   ;;  %v396_v4 = vld [vmem:[#allocation7 + $0x54] ss:$8 sps:$4 sm:$0xff]  }
  0x27   :  { %286 = vmatpush1.bf16.msra.mxu0 %v392_v1  ;;  %v398_v5 = vld [vmem:[#allocation7 + $0x50] ss:$8 sps:$4 sm:$0xff]   ;;  %v399_v6 = vld [vmem:[#allocation7 + $0x44] ss:$8 sps:$4 sm:$0xff]   ;;  %v401_v7 = vld [vmem:[#allocation7 + $0x40] ss:$8 sps:$4 sm:$0xff]  }
  0x28   :  { %287 = vmatprep.subr.bf16.mxu0 %v393_v2  ;;  %v402_v9 = vld [vmem:[#allocation7 + $0x34] ss:$8 sps:$4 sm:$0xff]   ;;  %v404_v10 = vld [vmem:[#allocation7 + $0x30] ss:$8 sps:$4 sm:$0xff]   ;;  %v566_v11 = vshrl.u32 %v65_v8, 7  ;;  %s529_s5 = smov [#allocation8]  }
  0x29   :  { %v405_v12 = vld [vmem:[#allocation7 + $0x24] ss:$8 sps:$4 sm:$0xff]   ;;  %v407_v13 = vld [vmem:[#allocation7 + $0x20] ss:$8 sps:$4 sm:$0xff]   ;;  %v408_v15 = vld [vmem:[#allocation7 + $0x14] ss:$8 sps:$4 sm:$0xff]  }
  0x2a   :  { %v71_v14 = vsub.s32 1, %v566_v11  ;;  %v57_v16 = vld [vmem:[#allocation2] sm:$0xff]  ;;  %v58_v17 = vld [vmem:[#allocation2 + $0x8] sm:$0xff]  ;;  %v59_v18 = vld [vmem:[#allocation5] sm:$0x3]  ;;  %v67_v39 = vsub.s32 0, %v566_v11 }
  0x2b   :  { %288 = vmatpush1.bf16.msra.mxu0 %v395_v3  ;;  %v61_v19 = vunpack.c.h.bf16 %v57_v16  ;;  %v63_v20 = vunpack.c.h.bf16 %v58_v17  ;;  %v410_v21 = vld [vmem:[#allocation7 + $0x10] ss:$8 sps:$4 sm:$0xff]   ;;  %v411_v23 = vld [vmem:[#allocation7 + $0x4] ss:$8 sps:$4 sm:$0xff]   ;;  %v413_v26 = vld [vmem:[#allocation7] ss:$8 sps:$4 sm:$0xff]   ;;  %v60_v42 = vunpack.c.l.bf16 %v57_v16  ;;  %v62_v43 = vunpack.c.l.bf16 %v58_v17 }
  0x2c   :  { %289 = vmatprep.subr.bf16.mxu0 %v396_v4  ;;  %v72_v22 = vrot.slane %v59_v18, %v71_v14  ;;  %v414_v28 = vld [vmem:[#allocation7 + $0xf4] ss:$8 sps:$4 sm:$0xff]   ;;  %v416_v29 = vld [vmem:[#allocation7 + $0xf0] ss:$8 sps:$4 sm:$0xff]   ;;  %v417_v30 = vld [vmem:[#allocation7 + $0xe4] ss:$8 sps:$4 sm:$0xff]   ;;  %v68_v44 = vrot.slane %v59_v18, %v67_v39 }
  0x2d   :  { %v419_v31 = vld [vmem:[#allocation7 + $0xe0] ss:$8 sps:$4 sm:$0xff]   ;;  %v420_v32 = vld [vmem:[#allocation7 + $0xd4] ss:$8 sps:$4 sm:$0xff]   ;;  %v422_v33 = vld [vmem:[#allocation7 + $0xd0] ss:$8 sps:$4 sm:$0xff]  }
  0x2e   :  { %v76_v24 = vmul.f32 %v72_v22, %v61_v19  ;;  %v78_v25 = vmul.f32 %v72_v22, %v63_v20  ;;  %v423_v34 = vld [vmem:[#allocation7 + $0xc4] ss:$8 sps:$4 sm:$0xff]   ;;  %v425_v35 = vld [vmem:[#allocation7 + $0xc0] ss:$8 sps:$4 sm:$0xff]   ;;  %v426_v36 = vld [vmem:[#allocation7 + $0xb4] ss:$8 sps:$4 sm:$0xff]   ;;  %v75_v47 = vmul.f32 %v68_v44, %v60_v42  ;;  %v77_v48 = vmul.f32 %v68_v44, %v62_v43 }
  0x2f   :  { %290 = vmatpush1.bf16.msra.mxu0 %v398_v5  ;;  %v428_v37 = vld [vmem:[#allocation7 + $0xb0] ss:$8 sps:$4 sm:$0xff]   ;;  %v429_v38 = vld [vmem:[#allocation7 + $0xa4] ss:$8 sps:$4 sm:$0xff]   ;;  %v431_v40 = vld [vmem:[#allocation7 + $0xa0] ss:$8 sps:$4 sm:$0xff]  }
  0x30   :  { %291 = vmatprep.subr.bf16.mxu0 %v399_v6  ;;  %v80_v27 = vpack.c.bf16 %v78_v25, %v76_v24  ;;  %v432_v41 = vld [vmem:[#allocation7 + $0x94] ss:$8 sps:$4 sm:$0xff]   ;;  %v434_v45 = vld [vmem:[#allocation7 + $0x90] ss:$8 sps:$4 sm:$0xff]   ;;  %v435_v46 = vld [vmem:[#allocation7 + $0x84] ss:$8 sps:$4 sm:$0xff]   ;;  %v79_v50 = vpack.c.bf16 %v77_v48, %v75_v47 }
  0x31   :  { %v437_v49 = vld [vmem:[#allocation7 + $0x80] ss:$8 sps:$4 sm:$0xff]   ;;  %v113_v51 = vld [vmem:[%s583_s3] sm:$0x3]  ;;  %s337_s6 = sshll.u32 %s529_s5, 4  ;;  %s338_s6 = int_to_ptr.vmem [resolvable:$true] %s337_s6 }
  0x32   :  { %317 = vmatprep.mubr.bf16.mxu0 %v80_v27  ;;  %v118_v52 = vrot.slane %v113_v51, %v67_v39  ;;  %v122_v53 = vrot.slane %v113_v51, %v71_v14  ;;  %s498_s3 = scalar_lea.vmem %s338_s6, 512  ;;  %p503_p2 = scmp.lt.s32.totalorder %s338_s6, %s338_s6 }
  0x33   :  { %292 = vmatpush1.bf16.msra.mxu0 %v401_v7  ;;  %p499_p1 = scmp.ne.s32.totalorder %s338_s6, %s498_s3  ;;  %p504_p3 = scmp.lt.s32.totalorder %s498_s3, %s498_s3 }
  0x34   :  { %293 = vmatprep.subr.bf16.mxu0 %v402_v9 }
  0x35   :  { %p505_p4 = por %p504_p3, %p503_p2 }
  0x37   :  { %294 = vmatpush1.bf16.msra.mxu0 %v404_v10  ;;  %p506_p5 = pnand %p505_p4, %p499_p1 }
  0x38   :  { %295 = vmatprep.subr.bf16.mxu0 %v405_v12 }
  0x3b   :  { %296 = vmatpush1.bf16.msra.mxu0 %v407_v13 }
  0x3c   :  { %297 = vmatprep.subr.bf16.mxu0 %v408_v15 }
  0x3f   :  { %298 = vmatpush1.bf16.msra.mxu0 %v410_v21 }
  0x40   :  { %299 = vmatprep.subr.bf16.mxu0 %v411_v23 }
  0x43   :  { %300 = vmatpush1.bf16.msra.mxu0 %v413_v26 }
  0x44   :  { %301 = vmatprep.subr.bf16.mxu0 %v414_v28 }
  0x47   :  { %302 = vmatpush2.bf16.msra.mxu0 %v416_v29 }
  0x48   :  { %303 = vmatprep.subr.bf16.mxu0 %v417_v30 }
  0x4b   :  { %304 = vmatpush2.bf16.msra.mxu0 %v419_v31 }
  0x4c   :  { %305 = vmatprep.subr.bf16.mxu0 %v420_v32 }
  0x4f   :  { %306 = vmatpush2.bf16.msra.mxu0 %v422_v33 }
  0x50   :  { %307 = vmatprep.subr.bf16.mxu0 %v423_v34 }
  0x53   :  { %308 = vmatpush2.bf16.msra.mxu0 %v425_v35 }
  0x54   :  { %309 = vmatprep.subr.bf16.mxu0 %v426_v36 }
  0x57   :  { %310 = vmatpush2.bf16.msra.mxu0 %v428_v37 }
  0x58   :  { %311 = vmatprep.subr.bf16.mxu0 %v429_v38 }
  0x5b   :  { %312 = vmatpush2.bf16.msra.mxu0 %v431_v40 }
  0x5c   :  { %313 = vmatprep.subr.bf16.mxu0 %v432_v41 }
  0x5f   :  { %314 = vmatpush2.bf16.msra.mxu0 %v434_v45 }
  0x60   :  { %315 = vmatprep.subr.bf16.mxu0 %v435_v46 }
  0x63   :  { %316 = vmatpush2.bf16.msra.mxu0 %v437_v49 }
  0x66   :  { %318 = vmatmul.mubr.bf16.vlgmr.msra.gmra.mxu0 %v79_v50 }
 0x126   :  { %v319_v54 = vpop.f32.mrf.mxu0 }
 0x127   :  { %v320_v55 = vadd.f32 %v319_v54, %v118_v52 }
 0x128   :  { %v321_v56 = vpop.f32.mrf.mxu0 }
 0x129   :  { %328 = vst [vmem:[#allocation8] sm:$0xff] %v320_v55  ;;  %v322_v57 = vadd.f32 %v321_v56, %v122_v53 }
 0x12a   :  { %v323_v58 = vpop.f32.mrf.mxu0 }
 0x12b   :  { %329 = vst [vmem:[#allocation8 + $0x8] sm:$0xff] %v322_v57  ;;  %v324_v59 = vadd.f32 %v323_v58, %v118_v52 }
 0x12c   :  { %v325_v60 = vpop.f32.mrf.mxu0 }
 0x12d   :  { %330 = vst [vmem:[#allocation8 + $0x10] sm:$0xff] %v324_v59  ;;  %v326_v61 = vadd.f32 %v325_v60, %v122_v53 }
 0x12f   :  { %331 = vst [vmem:[#allocation8 + $0x18] sm:$0xff] %v326_v61 }
 0x130   :  { %509 = shalt.err (!%p506_p5)
}
 0x131   :  { %s530_s7 = smov 256   ;;  %s531_s8 = smov 16  }
 0x132   :  { %343 = dma.vmem_to_hbm [thread:$0]  %s338_s6, 512, %s584_s4, [#allocation4], %s530_s7, %s530_s7, %s531_s8  }
 0x133   :  { %522 = dma.done.wait [#allocation4], 512  }
 0x134   :  { %523 = vsyncadd [#allocation4], 4294966784 }
 0x135   :  { %347 = vsyncpa [#allocation3], 1 }
 0x136   :  { %348 = vsyncpa [#allocation6], 1 }
 0x137   :  { %349 = vsyncpa [#allocation4], 1 }

</bundles_post_ra>
